<compile_context>
chip_gen: v7x
topology: tpu7x:2x2x1
jax: 0.10.0
libtpu: 0.0.40
codegen_flags: <defaults>
</compile_context>

<pallas_src>
import jax
import jax.numpy as jnp
from jax.experimental import pallas as pl
from jax.experimental.pallas import tpu as pltpu

LANE = 128
MAX_BATCH_TILE = 1024


def _round_up(n, m):
    return ((n + m - 1) // m) * m


def dqn_mlp_kernel(x_ref, w1_ref, b1_ref, w2_ref, b2_ref, w3_ref, b3_ref, o_ref):
    # Cast x to the MXU (weight) dtype in-kernel: free-ish VPU cast on VMEM data,
    # avoids a separate wrapper-side cast/pad pass over the activation in HBM.
    x = x_ref[...].astype(w1_ref.dtype)
    # fc1 + ReLU  (MXU matmul, f32 accumulation; bias add + ReLU stay in f32)
    h1 = jnp.dot(x, w1_ref[...], preferred_element_type=jnp.float32) + b1_ref[...]
    h1 = jnp.maximum(h1, 0.0).astype(w2_ref.dtype)
    # fc2 + ReLU
    h2 = jnp.dot(h1, w2_ref[...], preferred_element_type=jnp.float32) + b2_ref[...]
    h2 = jnp.maximum(h2, 0.0).astype(w3_ref.dtype)
    # fc3 (no activation): 128-wide matmul, then slice to the true action width at
    # the store so only (TB, A) Q-values are written back to HBM (no lane padding).
    q = jnp.dot(h2, w3_ref[...], preferred_element_type=jnp.float32)   # (TB, Ap)
    a = o_ref.shape[-1]
    o_ref[...] = (q[:, :a] + b3_ref[...]).astype(o_ref.dtype)


def prepare_params(params, compute_dtype=jnp.bfloat16):
    """Pad/cast the weights ONCE (reuse across forward calls).

    Zero-padding the hidden dim to 128 lanes is exact: relu(0 + 0) = 0 and zero
    rows/cols contribute nothing to downstream matmuls.  b3 stays unpadded so the
    kernel/wrapper can recover the true action width statically.
    """
    w1, b1 = params["w1"], params["b1"]
    w2, b2 = params["w2"], params["b2"]
    w3, b3 = params["w3"], params["b3"]
    S, H = w1.shape
    A = w3.shape[1]
    Hp = _round_up(H, LANE)
    Ap = _round_up(A, LANE)

    def pad2(a, rows, cols):
        return jnp.pad(a, ((0, rows - a.shape[0]), (0, cols - a.shape[1])))

    return {
        "w1": pad2(w1, S, Hp).astype(compute_dtype),
        "b1": pad2(b1.reshape(1, -1), 1, Hp).astype(jnp.float32),
        "w2": pad2(w2, Hp, Hp).astype(compute_dtype),
        "b2": pad2(b2.reshape(1, -1), 1, Hp).astype(jnp.float32),
        "w3": pad2(w3, Hp, Ap).astype(compute_dtype),
        "b3": b3.reshape(1, -1).astype(jnp.float32),        # (1, A), unpadded
    }


def dqn_forward(x, prepared, *, batch_tile=None):
    """x: (B, state_size) float. prepared: output of prepare_params(). Returns (B, A) f32."""
    w1p, b1p = prepared["w1"], prepared["b1"]
    w2p, b2p = prepared["w2"], prepared["b2"]
    w3p, b3p = prepared["w3"], prepared["b3"]

    B, S = x.shape
    Hp = w1p.shape[1]
    Ap = w3p.shape[1]
    A = b3p.shape[1]
    if w1p.shape[0] != S:
        raise ValueError(f"state_size mismatch: x has {S}, weights expect {w1p.shape[0]}")

    # Sublane alignment for the batch tile: sub-32-bit refs pack 2 rows per sublane.
    itemsize = min(jnp.dtype(x.dtype).itemsize, jnp.dtype(w1p.dtype).itemsize)
    align = 8 if itemsize >= 4 else 16

    if batch_tile is None:
        # Memory-pipeline-friendly tile (large), but keep >= 2 grid steps so the
        # "parallel" batch axis can span both TensorCores on v7x.
        TB = min(MAX_BATCH_TILE, pl.cdiv(B, 2))
    else:
        TB = min(batch_tile, B)
    TB = max(align, _round_up(TB, align))      # re-round AFTER the min()

    grid = (pl.cdiv(B, TB),)                   # ragged edge block; no batch padding

    const = lambda shape: pl.BlockSpec(shape, lambda i: (0, 0))   # resident in VMEM

    out = pl.pallas_call(
        dqn_mlp_kernel,
        out_shape=jax.ShapeDtypeStruct((B, A), jnp.float32),
        grid=grid,
        in_specs=[
            pl.BlockSpec((TB, S), lambda i: (i, 0)),   # x: tiled over batch
            const((S, Hp)), const((1, Hp)),            # fc1
            const((Hp, Hp)), const((1, Hp)),           # fc2
            const((Hp, Ap)), const((1, A)),            # fc3 (b3 unpadded)
        ],
        out_specs=pl.BlockSpec((TB, A), lambda i: (i, 0)),   # lane dim = full A
        compiler_params=pltpu.CompilerParams(dimension_semantics=("parallel",)),
    )(x, w1p, b1p, w2p, b2p, w3p, b3p)
    return out


def init_params(key, state_size, action_size, hidden=64):
    """Deterministic init matching PyTorch nn.Linear shapes (stored transposed as (in, out))."""
    ks = jax.random.split(key, 6)

    def lin(kw, kb, fan_in, fan_out):
        bound = 1.0 / jnp.sqrt(jnp.float32(fan_in))
        w = jax.random.uniform(kw, (fan_in, fan_out), jnp.float32, -bound, bound)
        b = jax.random.uniform(kb, (1, fan_out), jnp.float32, -bound, bound)
        return w, b

    w1, b1 = lin(ks[0], ks[1], state_size, hidden)
    w2, b2 = lin(ks[2], ks[3], hidden, hidden)
    w3, b3 = lin(ks[4], ks[5], hidden, action_size)
    return {"w1": w1, "b1": b1, "w2": w2, "b2": b2, "w3": w3, "b3": b3}


def reference_forward(x, params, compute_dtype=jnp.bfloat16):
    """Plain-JAX reference with the same cast/accumulation discipline as the kernel."""
    def layer(a, w, b):
        y = jnp.dot(a.astype(compute_dtype), w.astype(compute_dtype),
                    preferred_element_type=jnp.float32,
                    precision=jax.lax.Precision.HIGHEST)
        return y + b.reshape(1, -1).astype(jnp.float32)

    h1 = jnp.maximum(layer(x, params["w1"], params["b1"]), 0.0)
    h2 = jnp.maximum(layer(h1, params["w2"], params["b2"]), 0.0)
    return layer(h2, params["w3"], params["b3"])


if __name__ == "__main__":
    key = jax.random.PRNGKey(0)
    k_p, k_x1, k_x2 = jax.random.split(key, 3)

    state_size, action_size = 8, 4
    raw_params = init_params(k_p, state_size, action_size)

    fwd = jax.jit(dqn_forward)

    # 1) Replay-buffer style batch (not a tile multiple -> ragged edge block, grid=2),
    #    bf16 MXU weights (default), f32 accumulation — compared against an
    #    identically-cast JAX reference.
    prep_bf16 = prepare_params(raw_params, compute_dtype=jnp.bfloat16)
    x_big = jax.random.normal(k_x2, (300, state_size), jnp.float32)
    out_big = jax.block_until_ready(fwd(x_big, prep_bf16))
    ref_big = reference_forward(x_big, raw_params, compute_dtype=jnp.bfloat16)
    assert out_big.shape == (300, action_size)
    assert jnp.allclose(out_big, ref_big, atol=1e-2, rtol=1e-2), "bf16 mismatch vs reference"

    # 2) Tiny act()-style batch, f32 weights.
    prep_f32 = prepare_params(raw_params, compute_dtype=jnp.float32)
    x_small = jax.random.normal(k_x1, (8, state_size), jnp.float32)
    out_small = jax.block_until_ready(fwd(x_small, prep_f32))
    ref_small = reference_forward(x_small, raw_params, compute_dtype=jnp.float32)
    assert out_small.shape == (8, action_size)
    assert jnp.allclose(out_small, ref_small, atol=2e-2, rtol=2e-2), "f32 mismatch vs reference"

    print("KERNEL_OK")
</pallas_src>

<mosaic_0001>
module attributes {stable_mosaic.version = 11 : i64} {
  func.func @dqn_mlp_kernel(%arg0: i32, %arg1: memref<160x8xf32, #tpu.memory_space<vmem>>, %arg2: memref<8x128xbf16, #tpu.memory_space<vmem>>, %arg3: memref<1x128xf32, #tpu.memory_space<vmem>>, %arg4: memref<128x128xbf16, #tpu.memory_space<vmem>>, %arg5: memref<1x128xf32, #tpu.memory_space<vmem>>, %arg6: memref<128x128xbf16, #tpu.memory_space<vmem>>, %arg7: memref<1x4xf32, #tpu.memory_space<vmem>>, %arg8: memref<160x4xf32, #tpu.memory_space<vmem>>) attributes {dimension_semantics = [#tpu.dimension_semantics<parallel>], iteration_bounds = array<i64: 2>, scalar_prefetch = 0 : i64, scratch_operands = 0 : i64, tpu.core_type = #tpu.core_type<tc>, window_params = [{transform_indices = @transform_0, window_bounds = array<i64: 160, 8>}, {pipeline_mode = #tpu.pipeline_mode<synchronous>, transform_indices = @transform_1, window_bounds = array<i64: 8, 128>}, {pipeline_mode = #tpu.pipeline_mode<synchronous>, transform_indices = @transform_2, window_bounds = array<i64: 1, 128>}, {pipeline_mode = #tpu.pipeline_mode<synchronous>, transform_indices = @transform_3, window_bounds = array<i64: 128, 128>}, {pipeline_mode = #tpu.pipeline_mode<synchronous>, transform_indices = @transform_4, window_bounds = array<i64: 1, 128>}, {pipeline_mode = #tpu.pipeline_mode<synchronous>, transform_indices = @transform_5, window_bounds = array<i64: 128, 128>}, {pipeline_mode = #tpu.pipeline_mode<synchronous>, transform_indices = @transform_6, window_bounds = array<i64: 1, 4>}, {transform_indices = @transform_7, window_bounds = array<i64: 160, 4>}]} {
    %c0 = arith.constant 0 : index
    %c0_0 = arith.constant 0 : index
    %0 = vector.load %arg1[%c0, %c0_0] : memref<160x8xf32, #tpu.memory_space<vmem>>, vector<160x8xf32>
    %1 = arith.truncf %0 : vector<160x8xf32> to vector<160x8xbf16>
    %c0_1 = arith.constant 0 : index
    %c0_2 = arith.constant 0 : index
    %2 = vector.load %arg2[%c0_1, %c0_2] : memref<8x128xbf16, #tpu.memory_space<vmem>>, vector<8x128xbf16>
    %cst = arith.constant dense<0.000000e+00> : vector<160x128xf32>
    %3 = tpu.matmul %1, %2, %cst {dimension_numbers = #tpu.dot_dimension_numbers<[1], [0], [0], [1], [0, 0, 1, 1], [], []>} : vector<160x8xbf16>, vector<8x128xbf16>, vector<160x128xf32> -> vector<160x128xf32>
    %c0_3 = arith.constant 0 : index
    %c0_4 = arith.constant 0 : index
    %4 = vector.load %arg3[%c0_3, %c0_4] : memref<1x128xf32, #tpu.memory_space<vmem>>, vector<1x128xf32>
    %5 = vector.broadcast %4 : vector<1x128xf32> to vector<160x128xf32>
    %6 = arith.addf %3, %5 : vector<160x128xf32>
    %cst_5 = arith.constant 0.000000e+00 : f32
    %7 = vector.broadcast %cst_5 : f32 to vector<160x128xf32>
    %8 = arith.maximumf %6, %7 : vector<160x128xf32>
    %9 = arith.truncf %8 : vector<160x128xf32> to vector<160x128xbf16>
    %c0_6 = arith.constant 0 : index
    %c0_7 = arith.constant 0 : index
    %10 = vector.load %arg4[%c0_6, %c0_7] : memref<128x128xbf16, #tpu.memory_space<vmem>>, vector<128x128xbf16>
    %cst_8 = arith.constant dense<0.000000e+00> : vector<160x128xf32>
    %11 = tpu.matmul %9, %10, %cst_8 {dimension_numbers = #tpu.dot_dimension_numbers<[1], [0], [0], [1], [0, 0, 1, 1], [], []>} : vector<160x128xbf16>, vector<128x128xbf16>, vector<160x128xf32> -> vector<160x128xf32>
    %c0_9 = arith.constant 0 : index
    %c0_10 = arith.constant 0 : index
    %12 = vector.load %arg5[%c0_9, %c0_10] : memref<1x128xf32, #tpu.memory_space<vmem>>, vector<1x128xf32>
    %13 = vector.broadcast %12 : vector<1x128xf32> to vector<160x128xf32>
    %14 = arith.addf %11, %13 : vector<160x128xf32>
    %cst_11 = arith.constant 0.000000e+00 : f32
    %15 = vector.broadcast %cst_11 : f32 to vector<160x128xf32>
    %16 = arith.maximumf %14, %15 : vector<160x128xf32>
    %17 = arith.truncf %16 : vector<160x128xf32> to vector<160x128xbf16>
    %c0_12 = arith.constant 0 : index
    %c0_13 = arith.constant 0 : index
    %18 = vector.load %arg6[%c0_12, %c0_13] : memref<128x128xbf16, #tpu.memory_space<vmem>>, vector<128x128xbf16>
    %cst_14 = arith.constant dense<0.000000e+00> : vector<160x128xf32>
    %19 = tpu.matmul %17, %18, %cst_14 {dimension_numbers = #tpu.dot_dimension_numbers<[1], [0], [0], [1], [0, 0, 1, 1], [], []>} : vector<160x128xbf16>, vector<128x128xbf16>, vector<160x128xf32> -> vector<160x128xf32>
    %20 = vector.extract_strided_slice %19 {offsets = [0, 0], sizes = [160, 4], strides = [1, 1]} : vector<160x128xf32> to vector<160x4xf32>
    %c0_15 = arith.constant 0 : index
    %c0_16 = arith.constant 0 : index
    %21 = vector.load %arg7[%c0_15, %c0_16] : memref<1x4xf32, #tpu.memory_space<vmem>>, vector<1x4xf32>
    %22 = vector.broadcast %21 : vector<1x4xf32> to vector<160x4xf32>
    %23 = arith.addf %20, %22 : vector<160x4xf32>
    %c0_17 = arith.constant 0 : index
    %c0_18 = arith.constant 0 : index
    %24 = vector.load %arg8[%c0_17, %c0_18] : memref<160x4xf32, #tpu.memory_space<vmem>>, vector<160x4xf32>
    tpu.vector_store %arg8[%c0_17, %c0_18], %23 {strides = array<i32>} : memref<160x4xf32, #tpu.memory_space<vmem>>, vector<160x4xf32>,
    return
  }
  func.func @transform_0(%arg0: i32) -> (i32, i32) {
    %c0_i32 = arith.constant 0 : i32
    %c0_i32_0 = arith.constant 0 : i32
    return %arg0, %c0_i32 : i32, i32
  }
  func.func @transform_1(%arg0: i32) -> (i32, i32) {
    %c0_i32 = arith.constant 0 : i32
    %c0_i32_0 = arith.constant 0 : i32
    %c0_i32_1 = arith.constant 0 : i32
    return %c0_i32, %c0_i32_0 : i32, i32
  }
  func.func @transform_2(%arg0: i32) -> (i32, i32) {
    %c0_i32 = arith.constant 0 : i32
    %c0_i32_0 = arith.constant 0 : i32
    %c0_i32_1 = arith.constant 0 : i32
    return %c0_i32, %c0_i32_0 : i32, i32
  }
  func.func @transform_3(%arg0: i32) -> (i32, i32) {
    %c0_i32 = arith.constant 0 : i32
    %c0_i32_0 = arith.constant 0 : i32
    %c0_i32_1 = arith.constant 0 : i32
    return %c0_i32, %c0_i32_0 : i32, i32
  }
  func.func @transform_4(%arg0: i32) -> (i32, i32) {
    %c0_i32 = arith.constant 0 : i32
    %c0_i32_0 = arith.constant 0 : i32
    %c0_i32_1 = arith.constant 0 : i32
    return %c0_i32, %c0_i32_0 : i32, i32
  }
  func.func @transform_5(%arg0: i32) -> (i32, i32) {
    %c0_i32 = arith.constant 0 : i32
    %c0_i32_0 = arith.constant 0 : i32
    %c0_i32_1 = arith.constant 0 : i32
    return %c0_i32, %c0_i32_0 : i32, i32
  }
  func.func @transform_6(%arg0: i32) -> (i32, i32) {
    %c0_i32 = arith.constant 0 : i32
    %c0_i32_0 = arith.constant 0 : i32
    %c0_i32_1 = arith.constant 0 : i32
    return %c0_i32, %c0_i32_0 : i32, i32
  }
  func.func @transform_7(%arg0: i32) -> (i32, i32) {
    %c0_i32 = arith.constant 0 : i32
    %c0_i32_0 = arith.constant 0 : i32
    return %arg0, %c0_i32 : i32, i32
  }
}

</mosaic_0001>

<bundles_post_ra>
// kernel: dqn_forward.1
= control target key start
LH: loop header
LB: loop body
LE: loop exit
PB: predicated region body
PF: predicated region fallthrough
CT: control target
= control target key end

     0   :  { %s1679_s24 = smov 0   ;;  %s1681_s25 = smov 0   ;;  %s1998_s0 = inlined_call_operand.vmem [shape: f32[300,8], index: 0, kind: input, shape index: {}]   ;;  %s1999_s1 = inlined_call_operand.vmem [shape: bf16[8,128], index: 1, kind: input, shape index: {}]   ;;  %s2000_s2 = inlined_call_operand.vmem [shape: f32[1,128], index: 2, kind: input, shape index: {}]   ;;  %s2001_s3 = inlined_call_operand.vmem [shape: bf16[128,128], index: 3, kind: input, shape index: {}]   ;;  %s2002_s4 = inlined_call_operand.vmem [shape: f32[1,128], index: 4, kind: input, shape index: {}]   ;;  %s2003_s5 = inlined_call_operand.vmem [shape: bf16[128,128], index: 5, kind: input, shape index: {}]   ;;  %s2004_s6 = inlined_call_operand.vmem [shape: f32[1,4], index: 6, kind: input, shape index: {}]   ;;  %s2005_s7 = inlined_call_operand.vmem [shape: f32[300,4], index: 7, kind: output, shape index: {}]  }
   0x1   :  { %s1683_s26 = smov 0  }
   0x2 LB: > { %s1692_s27 = sadd.s32 4294967295, %s1605_s26   ;;  %s1694_s28 = sadd.s32 1, %s1605_s26   ;;  %s1605_s26 = sphi %s1683_s26, %s2012_s26   ;;  %s1601_s25 = sphi %s1681_s25, %s2011_s25   ;;  %s1597_s24 = sphi %s1679_s24, %s2010_s24  }
   0x3   : > { %s173_s29 = ssub.s32 %s1605_s26, %s1694_s28  ;;  %s176_s30 = sadd.s32 1, %s1601_s25 }
   0x4   : > { %p174_p0 = scmp.eq.s32.totalorder %s173_s29, 0  ;;  %p186_p1 = scmp.ne.s32.totalorder %s1601_s25, %s1597_s24 }
   0x5   : > { %p187_p2 = scmp.eq.s32.totalorder %s1692_s27, 1  ;;  %p1252_p3 = scmp.ge.s32.totalorder %s1605_s26, 1 }
   0x6   : > { %s1702_s8 = scalar_select %p174_p0, %s1601_s25, %s176_s30  }
   0x7   : > { %p1704_p4 = por %p187_p2, %p186_p1  ;;  %p246_p5 = scmp.lt.s32.totalorder %s1605_s26, 3 }
   0x9   : > { %p247_p6 = pnand %p1252_p3, %p246_p5 }
   0xa   : > { %v331_v0 = vld [vmem:[%s1999_s1] sm:$0xf] (!%p247_p6)  ;;  %vm370_vm0 = vcmask (!%p247_p6), 1043456   ;;  %s1712_s12 = smul.u32 (!%p247_p6), 20, %s1692_s27  ;;  %vm339_vm1 = vcmask (!%p247_p6), 64512   ;;  %v1532_v18 = vld [vmem:[%s2001_s3 + $0x8] sm:$0xff] (!%p247_p6)  }
   0xb   : > { %250 = sbr.rel (%p247_p6) target bundleno = 783 (0x30f), region = 48  ;;  %v1531_v1 = vld [vmem:[%s2001_s3] sm:$0xff] (!%p247_p6)   ;;  %1439 = vmatprep.subr.msk.bf16.mxu0 (!%p247_p6), %vm370_vm0, %v331_v0  ;;  %v372_v2 = vsel (!%p247_p6), %vm370_vm0, %v331_v0, 0  ;;  %1440 = vmatprep.subr.msk.bf16.mxu1 (!%p247_p6), %vm370_vm0, %v331_v0  ;;  %v1533_v25 = vld [vmem:[%s2001_s3 + $0x10] sm:$0xff] (!%p247_p6)   ;;  %v1534_v30 = vld [vmem:[%s2001_s3 + $0x18] sm:$0xff] (!%p247_p6)   ;;  %s278_s22 = sand.u32 (!%p247_p6), 1, %s1597_s24  }
   0xc   : > { %1344 = vmatpush3.bf16.msra.mxu0 (!%p247_p6), %v372_v2  ;;  %p286_p7 = scmp.lt.s32.totalorder (!%p247_p6), %s1712_s12, 37  ;;  %1438 = vmatpush3.bf16.msra.mxu1 (!%p247_p6), %v372_v2  ;;  %v1535_v33 = vld [vmem:[%s2001_s3 + $0x20] sm:$0xff] (!%p247_p6)   ;;  %v1536_v36 = vld [vmem:[%s2001_s3 + $0x28] sm:$0xff] (!%p247_p6)   ;;  %v1537_v38 = vld [vmem:[%s2001_s3 + $0x30] sm:$0xff] (!%p247_p6)   ;;  %s1441_s23 = smul.u32 (!%p247_p6), 160, %s278_s22  ;;  %vm935_vm2 = vcmask (!%p247_p6), 31744  }
   0xd   : > { %1365 = vmatprep.subr.bf16.mxu1 (!%p247_p6), %v1531_v1  ;;  %v1538_v39 = vld [vmem:[%s2001_s3 + $0x38] sm:$0xff] (!%p247_p6)   ;;  %v1539_v40 = vld [vmem:[%s2003_s5] sm:$0xff] (!%p247_p6)   ;;  %v1540_v41 = vld [vmem:[%s2003_s5 + $0x8] sm:$0xff] (!%p247_p6)  }
   0xe   : > { %1401 = vmatprep.subr.bf16.mxu0 (!%p247_p6), %v1539_v40  ;;  %v1541_v42 = vld [vmem:[%s2003_s5 + $0x10] sm:$0xff] (!%p247_p6)   ;;  %v1542_v43 = vld [vmem:[%s2003_s5 + $0x18] sm:$0xff] (!%p247_p6)   ;;  %v1543_v44 = vld [vmem:[%s2003_s5 + $0x20] sm:$0xff] (!%p247_p6)   ;;  %s1853_s30 = scalar_lea.vmem (!%p247_p6), [#allocation2], %s1441_s23  }
   0xf   : > { %v1544_v45 = vld [vmem:[%s2003_s5 + $0x28] sm:$0xff] (!%p247_p6)   ;;  %v1796_v46 = vld [vmem:[%s2000_s2] ss:$0 sm:$0xff] (!%p247_p6) }
  0x12   : > { %s287_s15 = scalar_select %p286_p7, %s1712_s12, 37 }
  0x13   : > { %s964_s24 = ssub.s32 (%p1704_p4), 38, %s1712_s12  ;;  %s1295_s10 = smul.u32 (%p1704_p4), 160, %s1692_s27 }
  0x14   : > { %s1253_s16 = sshll.u32 %s287_s15, 3  ;;  %p965_p8 = scmp.lt.s32.totalorder (%p1704_p4), %s964_s24, 20 }
  0x15   : > { %s1722_s19 = scalar_lea.vmem %s1998_s0, %s1253_s16  ;;  %s1902_s14 = scalar_lea.vmem (%p1704_p4), %s2005_s7, %s1295_s10  }
  0x16   : > { %v301_v3 = vld [vmem:[%s1722_s19] sm:$0xff]  ;;  %v302_v4 = vld [vmem:[%s1722_s19 + $0x8] sm:$0xff]  ;;  %v303_v5 = vld [vmem:[%s1722_s19 + $0x10] sm:$0xff] }
  0x17   : > { %v321_v6 = vpack.c.bf16 %v302_v4, %v301_v3  ;;  %v304_v7 = vld [vmem:[%s1722_s19 + $0x18] sm:$0xff]  ;;  %v305_v8 = vld [vmem:[%s1722_s19 + $0x20] sm:$0xff]  ;;  %v306_v9 = vld [vmem:[%s1722_s19 + $0x28] sm:$0xff] }
  0x18   : > { %v322_v10 = vpack.c.bf16 %v304_v7, %v303_v5  ;;  %v323_v11 = vpack.c.bf16 %v306_v9, %v305_v8  ;;  %v307_v12 = vld [vmem:[%s1722_s19 + $0x30] sm:$0xff]  ;;  %v308_v13 = vld [vmem:[%s1722_s19 + $0x38] sm:$0xff]  ;;  %v309_v14 = vld [vmem:[%s1722_s19 + $0x40] sm:$0xff] }
  0x19   : > { %1345 = vmatprep.mubr.msk.bf16.mxu0 %vm339_vm1, %v321_v6  ;;  %v310_v15 = vld [vmem:[%s1722_s19 + $0x48] sm:$0xff]  ;;  %v317_v16 = vld [vmem:[%s1722_s19 + $0x80] sm:$0xff]  ;;  %v319_v20 = vld [vmem:[%s1722_s19 + $0x90] sm:$0xff]  ;;  %v324_v23 = vpack.c.bf16 %v308_v13, %v307_v12 }
  0x1a   : > { %1346 = vmatmul.mubr.msk.bf16.vlgmr.msra.gmra.mrb[0].mxu0 %vm339_vm1, %v322_v10  ;;  %v318_v17 = vld [vmem:[%s1722_s19 + $0x88] sm:$0xff]  ;;  %v320_v21 = vld [vmem:[%s1722_s19 + $0x98] sm:$0xff]  ;;  %v325_v24 = vpack.c.bf16 %v310_v15, %v309_v14  ;;  %v311_v26 = vld [vmem:[%s1722_s19 + $0x50] sm:$0xff] }
  0x1b   : > { %1349 = vmatprep.mubr.msk.bf16.mxu0 %vm339_vm1, %v323_v11  ;;  %v329_v19 = vpack.c.bf16 %v318_v17, %v317_v16  ;;  %v330_v22 = vpack.c.bf16 %v320_v21, %v319_v20  ;;  %v312_v27 = vld [vmem:[%s1722_s19 + $0x58] sm:$0xff]  ;;  %v313_v28 = vld [vmem:[%s1722_s19 + $0x60] sm:$0xff]  ;;  %v314_v29 = vld [vmem:[%s1722_s19 + $0x68] sm:$0xff]  ;;  %1402 = vmatpush3.bf16.msra.mxu0 %v1539_v40 }
  0x1c   : > { %v326_v31 = vpack.c.bf16 %v312_v27, %v311_v26  ;;  %v327_v32 = vpack.c.bf16 %v314_v29, %v313_v28  ;;  %v315_v34 = vld [vmem:[%s1722_s19 + $0x70] sm:$0xff]  ;;  %v316_v35 = vld [vmem:[%s1722_s19 + $0x78] sm:$0xff]  ;;  %1403 = vmatprep.subr.bf16.mxu0 %v1540_v41 }
  0x1d   : > { %1361 = vmatprep.mubr.msk.bf16.mxu1 %vm339_vm1, %v329_v19  ;;  %v328_v37 = vpack.c.bf16 %v316_v35, %v315_v34 }
  0x1e   : > { %1362 = vmatmul.mubr.msk.bf16.vlgmr.msra.gmra.mrb[0].mxu1 %vm339_vm1, %v330_v22 }
  0x1f   : > { %1366 = vmatpush3.bf16.msra.mxu1 %v1531_v1  ;;  %1404 = vmatpush3.bf16.msra.mxu0 %v1540_v41 }
  0x20   : > { %1367 = vmatprep.subr.bf16.mxu1 %v1532_v18  ;;  %1405 = vmatprep.subr.bf16.mxu0 %v1541_v42 }
  0x22   : > { %1350 = vmatmul.mubr.msk.bf16.gmra.mrb[4].mxu0 %vm339_vm1, %v324_v23 }
  0x23   : > { %1353 = vmatprep.mubr.msk.bf16.mxu0 %vm339_vm1, %v325_v24  ;;  %1368 = vmatpush3.bf16.msra.mxu1 %v1532_v18 }
  0x24   : > { %1369 = vmatprep.subr.bf16.mxu1 %v1533_v25  ;;  %1406 = vmatpush3.bf16.msra.mxu0 %v1541_v42 }
  0x25   : > { %1407 = vmatprep.subr.bf16.mxu0 %v1542_v43 }
  0x27   : > { %1370 = vmatpush3.bf16.msra.mxu1 %v1533_v25 }
  0x28   : > { %1371 = vmatprep.subr.bf16.mxu1 %v1534_v30  ;;  %1408 = vmatpush3.bf16.msra.mxu0 %v1542_v43 }
  0x29   : > { %1409 = vmatprep.subr.bf16.mxu0 %v1543_v44 }
  0x2a   : > { %1354 = vmatmul.mubr.msk.bf16.gmra.mrb[8].mxu0 %vm339_vm1, %v326_v31 }
  0x2b   : > { %1357 = vmatprep.mubr.msk.bf16.mxu0 %vm339_vm1, %v327_v32  ;;  %1372 = vmatpush3.bf16.msra.mxu1 %v1534_v30 }
  0x2c   : > { %1373 = vmatprep.subr.bf16.mxu1 %v1535_v33  ;;  %1410 = vmatpush3.bf16.msra.mxu0 %v1543_v44 }
  0x2d   : > { %1411 = vmatprep.subr.bf16.mxu0 %v1544_v45 }
  0x2f   : > { %1374 = vmatpush3.bf16.msra.mxu1 %v1535_v33 }
  0x30   : > { %1375 = vmatprep.subr.bf16.mxu1 %v1536_v36  ;;  %1412 = vmatpush3.bf16.msra.mxu0 %v1544_v45 }
  0x32   : > { %1358 = vmatmul.mubr.msk.bf16.gmra.mrb[12].mxu0 %vm339_vm1, %v328_v37 }
  0x33   : > { %1376 = vmatpush3.bf16.msra.mxu1 %v1536_v36 }
  0x34   : > { %1377 = vmatprep.subr.bf16.mxu1 %v1537_v38 }
  0x37   : > { %1378 = vmatpush3.bf16.msra.mxu1 %v1537_v38 }
  0x38   : > { %1379 = vmatprep.subr.bf16.mxu1 %v1538_v39 }
  0x3b   : > { %1380 = vmatpush3.bf16.msra.mxu1 %v1538_v39 }
  0xed   : > { %v1347_v47 = vpop.f32.mrb[0].mxu0 }
  0xee   : > { %v417_v48 = vadd.f32 %v1347_v47, %v1796_v46  ;;  %v408_v49 = vpop.f32.mrb[1].mxu0 }
  0xef   : > { %v409_v50 = vadd.f32 %v1796_v46, %v408_v49  ;;  %v1348_v51 = vpop.f32.mrb[2].mxu0 }
  0xf0   : > { %v420_v52 = vadd.f32 %v1348_v51, %v1796_v46  ;;  %v411_v53 = vpop.f32.mrb[3].mxu0  ;;  %v489_v55 = vmax.f32 %v417_v48, 0.0 }
  0xf1   : > { %v412_v54 = vadd.f32 %v1796_v46, %v411_v53  ;;  %v1363_v57 = vpop.f32.mrb[0].mxu1  ;;  %v487_v58 = vmax.f32 %v409_v50, 0.0 }
  0xf2   : > { %v490_v56 = vmax.f32 %v420_v52, 0.0  ;;  %v481_v60 = vadd.f32 %v1363_v57, %v1796_v46  ;;  %v472_v61 = vpop.f32.mrb[1].mxu1 }
  0xf3   : > { %v488_v59 = vmax.f32 %v412_v54, 0.0  ;;  %v473_v63 = vadd.f32 %v1796_v46, %v472_v61  ;;  %v1364_v0 = vpop.f32.mrb[2].mxu1  ;;  %v1545_v54 = vld [vmem:[%s2003_s5 + $0x30] sm:$0xff]  }
  0xf4   : > { %v508_v62 = vpack.c.bf16 %v490_v56, %v489_v55  ;;  %v505_v3 = vmax.f32 %v481_v60, 0.0  ;;  %v484_v4 = vadd.f32 %v1364_v0, %v1796_v46  ;;  %v475_v5 = vpop.f32.mrb[3].mxu1  ;;  %1413 = vmatprep.subr.bf16.mxu0 %v1545_v54  ;;  %v1827_v55 = vld [vmem:[%s2002_s4] ss:$0 sm:$0xff] }
  0xf5   : > { %v507_v1 = vpack.c.bf16 %v488_v59, %v487_v58  ;;  %v1351_v2 = vpop.f32.mrb[4].mxu0  ;;  %v503_v8 = vmax.f32 %v473_v63, 0.0  ;;  %v476_v9 = vadd.f32 %v1796_v46, %v475_v5  ;;  %1414 = vmatpush3.bf16.msra.mxu0 %v1545_v54 }
  0xf6   : > { %v433_v6 = vadd.f32 %v1351_v2, %v1796_v46  ;;  %v424_v7 = vpop.f32.mrb[5].mxu0  ;;  %v506_v12 = vmax.f32 %v484_v4, 0.0 }
  0xf7   : > { %v425_v10 = vadd.f32 %v1796_v46, %v424_v7  ;;  %v1352_v11 = vpop.f32.mrb[6].mxu0  ;;  %1381 = vmatprep.mubr.bf16.mxu1 %v507_v1  ;;  %v504_v15 = vmax.f32 %v476_v9, 0.0 }
  0xf8   : > { %v436_v13 = vadd.f32 %v1352_v11, %v1796_v46  ;;  %v427_v14 = vpop.f32.mrb[7].mxu0  ;;  %1382 = vmatmul.mubr.bf16.vlgmr.msra.gmra.mrb[4].mxu1 %v508_v62  ;;  %v516_v17 = vpack.c.bf16 %v506_v12, %v505_v3  ;;  %v493_v18 = vmax.f32 %v433_v6, 0.0 }
  0xf9   : > { %v428_v16 = vadd.f32 %v1796_v46, %v427_v14  ;;  %v515_v20 = vpack.c.bf16 %v504_v15, %v503_v8  ;;  %v491_v21 = vmax.f32 %v425_v10, 0.0 }
  0xfa   : > { %v494_v19 = vmax.f32 %v436_v13, 0.0 }
  0xfb   : > { %v492_v22 = vmax.f32 %v428_v16, 0.0 }
  0xfc   : > { %v510_v23 = vpack.c.bf16 %v494_v19, %v493_v18 }
  0xfd   : > { %v509_v24 = vpack.c.bf16 %v492_v22, %v491_v21  ;;  %v1355_v25 = vpop.f32.mrb[8].mxu0 }
  0xfe   : > { %v449_v26 = vadd.f32 %v1355_v25, %v1796_v46  ;;  %v440_v27 = vpop.f32.mrb[9].mxu0 }
  0xff   : > { %v441_v28 = vadd.f32 %v1796_v46, %v440_v27  ;;  %v1356_v29 = vpop.f32.mrb[10].mxu0  ;;  %1385 = vmatprep.mubr.bf16.mxu1 %v509_v24 }
 0x100   : > { %v452_v30 = vadd.f32 %v1356_v29, %v1796_v46  ;;  %v443_v31 = vpop.f32.mrb[11].mxu0  ;;  %1386 = vmatmul.mubr.bf16.gmra.mrb[8].mxu1 %v510_v23  ;;  %v497_v33 = vmax.f32 %v449_v26, 0.0 }
 0x101   : > { %v444_v32 = vadd.f32 %v1796_v46, %v443_v31  ;;  %v495_v35 = vmax.f32 %v441_v28, 0.0 }
 0x102   : > { %v498_v34 = vmax.f32 %v452_v30, 0.0 }
 0x103   : > { %v496_v36 = vmax.f32 %v444_v32, 0.0 }
 0x104   : > { %v512_v37 = vpack.c.bf16 %v498_v34, %v497_v33 }
 0x105   : > { %v511_v38 = vpack.c.bf16 %v496_v36, %v495_v35  ;;  %v1359_v39 = vpop.f32.mrb[12].mxu0 }
 0x106   : > { %v465_v40 = vadd.f32 %v1359_v39, %v1796_v46  ;;  %v456_v41 = vpop.f32.mrb[13].mxu0 }
 0x107   : > { %v457_v42 = vadd.f32 %v1796_v46, %v456_v41  ;;  %v1360_v43 = vpop.f32.mrb[14].mxu0  ;;  %1389 = vmatprep.mubr.bf16.mxu1 %v511_v38 }
 0x108   : > { %v468_v44 = vadd.f32 %v1360_v43, %v1796_v46  ;;  %v459_v45 = vpop.f32.mrb[15].mxu0  ;;  %1390 = vmatmul.mubr.bf16.gmra.mrb[12].mxu1 %v512_v37  ;;  %v501_v48 = vmax.f32 %v465_v40, 0.0 }
 0x109   : > { %v460_v47 = vadd.f32 %v1796_v46, %v459_v45  ;;  %v499_v50 = vmax.f32 %v457_v42, 0.0  ;;  %v1546_v46 = vld [vmem:[%s2003_s5 + $0x38] sm:$0xff]  }
 0x10a   : > { %v502_v49 = vmax.f32 %v468_v44, 0.0  ;;  %1415 = vmatprep.subr.bf16.mxu0 %v1546_v46 }
 0x10b   : > { %v500_v51 = vmax.f32 %v460_v47, 0.0  ;;  %1416 = vmatpush3.bf16.msra.mxu0 %v1546_v46 }
 0x10c   : > { %v514_v52 = vpack.c.bf16 %v502_v49, %v501_v48 }
 0x10d   : > { %v513_v53 = vpack.c.bf16 %v500_v51, %v499_v50 }
 0x10f   : > { %1393 = vmatprep.mubr.bf16.mxu1 %v513_v53 }
 0x110   : > { %1394 = vmatmul.mubr.bf16.gmra.mrb[16].mxu1 %v514_v52 }
 0x111   : > { %1397 = vmatprep.mubr.bf16.mxu1 %v515_v20 }
 0x118   : > { %1398 = vmatmul.mubr.bf16.gmra.mrb[20].mxu1 %v516_v17 }
 0x1cb   : > { %v1383_v56 = vpop.f32.mrb[4].mxu1 }
 0x1cc   : > { %v631_v57 = vadd.f32 %v1383_v56, %v1827_v55  ;;  %v622_v58 = vpop.f32.mrb[5].mxu1 }
 0x1cd   : > { %v623_v59 = vadd.f32 %v1827_v55, %v622_v58  ;;  %v1384_v60 = vpop.f32.mrb[6].mxu1 }
 0x1ce   : > { %v634_v61 = vadd.f32 %v1384_v60, %v1827_v55  ;;  %v625_v62 = vpop.f32.mrb[7].mxu1  ;;  %v703_v0 = vmax.f32 %v631_v57, 0.0 }
 0x1cf   : > { %v626_v63 = vadd.f32 %v1827_v55, %v625_v62  ;;  %v701_v2 = vmax.f32 %v623_v59, 0.0 }
 0x1d0   : > { %v704_v1 = vmax.f32 %v634_v61, 0.0 }
 0x1d1   : > { %v702_v3 = vmax.f32 %v626_v63, 0.0  ;;  %v1282_v63 = vld [vmem:[%s2004_s6] ss:$0 sm:$0xff] }
 0x1d2   : > { %v722_v4 = vpack.c.bf16 %v704_v1, %v703_v0 }
 0x1d3   : > { %v721_v5 = vpack.c.bf16 %v702_v3, %v701_v2  ;;  %v1387_v6 = vpop.f32.mrb[8].mxu1 }
 0x1d4   : > { %v647_v7 = vadd.f32 %v1387_v6, %v1827_v55  ;;  %v638_v8 = vpop.f32.mrb[9].mxu1 }
 0x1d5   : > { %v639_v9 = vadd.f32 %v1827_v55, %v638_v8  ;;  %v1388_v10 = vpop.f32.mrb[10].mxu1  ;;  %1417 = vmatprep.mubr.bf16.mxu0 %v721_v5 }
 0x1d6   : > { %v650_v11 = vadd.f32 %v1388_v10, %v1827_v55  ;;  %v641_v12 = vpop.f32.mrb[11].mxu1  ;;  %1418 = vmatmul.mubr.bf16.vlgmr.msra.gmra.mrb[16].mxu0 %v722_v4  ;;  %v707_v14 = vmax.f32 %v647_v7, 0.0 }
 0x1d7   : > { %v642_v13 = vadd.f32 %v1827_v55, %v641_v12  ;;  %v705_v16 = vmax.f32 %v639_v9, 0.0 }
 0x1d8   : > { %v708_v15 = vmax.f32 %v650_v11, 0.0 }
 0x1d9   : > { %v706_v17 = vmax.f32 %v642_v13, 0.0 }
 0x1da   : > { %v724_v18 = vpack.c.bf16 %v708_v15, %v707_v14 }
 0x1db   : > { %v723_v19 = vpack.c.bf16 %v706_v17, %v705_v16  ;;  %v1391_v20 = vpop.f32.mrb[12].mxu1 }
 0x1dc   : > { %v663_v21 = vadd.f32 %v1391_v20, %v1827_v55  ;;  %v654_v22 = vpop.f32.mrb[13].mxu1 }
 0x1dd   : > { %v655_v23 = vadd.f32 %v1827_v55, %v654_v22  ;;  %v1392_v24 = vpop.f32.mrb[14].mxu1  ;;  %1421 = vmatprep.mubr.bf16.mxu0 %v723_v19 }
 0x1de   : > { %v666_v25 = vadd.f32 %v1392_v24, %v1827_v55  ;;  %v657_v26 = vpop.f32.mrb[15].mxu1  ;;  %1422 = vmatmul.mubr.bf16.gmra.mrb[20].mxu0 %v724_v18  ;;  %v711_v28 = vmax.f32 %v663_v21, 0.0 }
 0x1df   : > { %v658_v27 = vadd.f32 %v1827_v55, %v657_v26  ;;  %v709_v30 = vmax.f32 %v655_v23, 0.0 }
 0x1e0   : > { %v712_v29 = vmax.f32 %v666_v25, 0.0 }
 0x1e1   : > { %v710_v31 = vmax.f32 %v658_v27, 0.0 }
 0x1e2   : > { %v726_v32 = vpack.c.bf16 %v712_v29, %v711_v28 }
 0x1e3   : > { %v725_v33 = vpack.c.bf16 %v710_v31, %v709_v30  ;;  %v1395_v34 = vpop.f32.mrb[16].mxu1 }
 0x1e4   : > { %v679_v35 = vadd.f32 %v1395_v34, %v1827_v55  ;;  %v670_v36 = vpop.f32.mrb[17].mxu1 }
 0x1e5   : > { %v671_v37 = vadd.f32 %v1827_v55, %v670_v36  ;;  %v1396_v38 = vpop.f32.mrb[18].mxu1  ;;  %1425 = vmatprep.mubr.bf16.mxu0 %v725_v33 }
 0x1e6   : > { %v682_v39 = vadd.f32 %v1396_v38, %v1827_v55  ;;  %v673_v40 = vpop.f32.mrb[19].mxu1  ;;  %1426 = vmatmul.mubr.bf16.gmra.mrb[24].mxu0 %v726_v32  ;;  %v715_v42 = vmax.f32 %v679_v35, 0.0 }
 0x1e7   : > { %v674_v41 = vadd.f32 %v1827_v55, %v673_v40  ;;  %v713_v44 = vmax.f32 %v671_v37, 0.0 }
 0x1e8   : > { %v716_v43 = vmax.f32 %v682_v39, 0.0 }
 0x1e9   : > { %v714_v45 = vmax.f32 %v674_v41, 0.0 }
 0x1ea   : > { %v728_v47 = vpack.c.bf16 %v716_v43, %v715_v42 }
 0x1eb   : > { %v727_v48 = vpack.c.bf16 %v714_v45, %v713_v44  ;;  %v1399_v49 = vpop.f32.mrb[20].mxu1 }
 0x1ec   : > { %v695_v50 = vadd.f32 %v1399_v49, %v1827_v55  ;;  %v686_v51 = vpop.f32.mrb[21].mxu1 }
 0x1ed   : > { %v687_v52 = vadd.f32 %v1827_v55, %v686_v51  ;;  %v1400_v53 = vpop.f32.mrb[22].mxu1  ;;  %1429 = vmatprep.mubr.bf16.mxu0 %v727_v48 }
 0x1ee   : > { %v698_v54 = vadd.f32 %v1400_v53, %v1827_v55  ;;  %v689_v46 = vpop.f32.mrb[23].mxu1  ;;  %1430 = vmatmul.mubr.bf16.gmra.mrb[28].mxu0 %v728_v47  ;;  %v719_v57 = vmax.f32 %v695_v50, 0.0 }
 0x1ef   : > { %v690_v56 = vadd.f32 %v1827_v55, %v689_v46  ;;  %v717_v59 = vmax.f32 %v687_v52, 0.0 }
 0x1f0   : > { %v720_v58 = vmax.f32 %v698_v54, 0.0 }
 0x1f1   : > { %v718_v60 = vmax.f32 %v690_v56, 0.0 }
 0x1f2   : > { %v730_v61 = vpack.c.bf16 %v720_v58, %v719_v57 }
 0x1f3   : > { %v729_v62 = vpack.c.bf16 %v718_v60, %v717_v59 }
 0x1f5   : > { %1433 = vmatprep.mubr.bf16.mxu0 %v729_v62 }
 0x1f6   : > { %1434 = vmatmul.mubr.bf16.gmra.mrb[32].mxu0 %v730_v61 }
 0x2a9   : > { %v1419_v0 = vpop.f32.mrb[16].mxu0 }
 0x2aa   : > { %v917_v1 = vadd.f32 %v1419_v0, %v1282_v63  ;;  %v829_v2 = vpop.f32.mrb[17].mxu0 }
 0x2ab   : > { %v915_v3 = vadd.f32 %v1282_v63, %v829_v2  ;;  %v1420_v55 = vpop.f32.mrb[18].mxu0 }
 0x2ac   : > { %938 = vst.msk [vmem:[%s1853_s30 + $0x10] sm:$0xff] %vm935_vm2, %v917_v1  ;;  %v918_v4 = vadd.f32 %v1420_v55, %v1282_v63  ;;  %v832_v5 = vpop.f32.mrb[19].mxu0 }
 0x2ad   : > { %936 = vst.msk [vmem:[%s1853_s30] sm:$0xff] %vm935_vm2, %v915_v3  ;;  %v916_v6 = vadd.f32 %v1282_v63, %v832_v5 }
 0x2ae   : > { %939 = vst.msk [vmem:[%s1853_s30 + $0x18] sm:$0xff] %vm935_vm2, %v918_v4 }
 0x2af   : > { %937 = vst.msk [vmem:[%s1853_s30 + $0x8] sm:$0xff] %vm935_vm2, %v916_v6 }
 0x2b1   : > { %v1423_v7 = vpop.f32.mrb[20].mxu0 }
 0x2b2   : > { %v921_v8 = vadd.f32 %v1423_v7, %v1282_v63  ;;  %v845_v9 = vpop.f32.mrb[21].mxu0 }
 0x2b3   : > { %v919_v10 = vadd.f32 %v1282_v63, %v845_v9  ;;  %v1424_v11 = vpop.f32.mrb[22].mxu0 }
 0x2b4   : > { %942 = vst.msk [vmem:[%s1853_s30 + $0x30] sm:$0xff] %vm935_vm2, %v921_v8  ;;  %v922_v12 = vadd.f32 %v1424_v11, %v1282_v63  ;;  %v848_v13 = vpop.f32.mrb[23].mxu0 }
 0x2b5   : > { %940 = vst.msk [vmem:[%s1853_s30 + $0x20] sm:$0xff] %vm935_vm2, %v919_v10  ;;  %v920_v14 = vadd.f32 %v1282_v63, %v848_v13 }
 0x2b6   : > { %943 = vst.msk [vmem:[%s1853_s30 + $0x38] sm:$0xff] %vm935_vm2, %v922_v12 }
 0x2b7   : > { %941 = vst.msk [vmem:[%s1853_s30 + $0x28] sm:$0xff] %vm935_vm2, %v920_v14 }
 0x2b9   : > { %v1427_v15 = vpop.f32.mrb[24].mxu0 }
 0x2ba   : > { %v925_v16 = vadd.f32 %v1427_v15, %v1282_v63  ;;  %v861_v17 = vpop.f32.mrb[25].mxu0 }
 0x2bb   : > { %v923_v18 = vadd.f32 %v1282_v63, %v861_v17  ;;  %v1428_v19 = vpop.f32.mrb[26].mxu0 }
 0x2bc   : > { %946 = vst.msk [vmem:[%s1853_s30 + $0x50] sm:$0xff] %vm935_vm2, %v925_v16  ;;  %v926_v20 = vadd.f32 %v1428_v19, %v1282_v63  ;;  %v864_v21 = vpop.f32.mrb[27].mxu0 }
 0x2bd   : > { %944 = vst.msk [vmem:[%s1853_s30 + $0x40] sm:$0xff] %vm935_vm2, %v923_v18  ;;  %v924_v22 = vadd.f32 %v1282_v63, %v864_v21 }
 0x2be   : > { %947 = vst.msk [vmem:[%s1853_s30 + $0x58] sm:$0xff] %vm935_vm2, %v926_v20 }
 0x2bf   : > { %945 = vst.msk [vmem:[%s1853_s30 + $0x48] sm:$0xff] %vm935_vm2, %v924_v22 }
 0x2c1   : > { %v1431_v23 = vpop.f32.mrb[28].mxu0 }
 0x2c2   : > { %v929_v24 = vadd.f32 %v1431_v23, %v1282_v63  ;;  %v877_v25 = vpop.f32.mrb[29].mxu0 }
 0x2c3   : > { %v927_v26 = vadd.f32 %v1282_v63, %v877_v25  ;;  %v1432_v27 = vpop.f32.mrb[30].mxu0 }
 0x2c4   : > { %950 = vst.msk [vmem:[%s1853_s30 + $0x70] sm:$0xff] %vm935_vm2, %v929_v24  ;;  %v930_v28 = vadd.f32 %v1432_v27, %v1282_v63  ;;  %v880_v29 = vpop.f32.mrb[31].mxu0 }
 0x2c5   : > { %948 = vst.msk [vmem:[%s1853_s30 + $0x60] sm:$0xff] %vm935_vm2, %v927_v26  ;;  %v928_v30 = vadd.f32 %v1282_v63, %v880_v29 }
 0x2c6   : > { %951 = vst.msk [vmem:[%s1853_s30 + $0x78] sm:$0xff] %vm935_vm2, %v930_v28 }
 0x2c7   : > { %949 = vst.msk [vmem:[%s1853_s30 + $0x68] sm:$0xff] %vm935_vm2, %v928_v30 }
 0x2c9   : > { %v1435_v31 = vpop.f32.mrb[32].mxu0  ;;  %962 = sbr.rel (!%p1704_p4) target bundleno = 783 (0x30f), region = 52 }
 0x2ca   : > { %v933_v32 = vadd.f32 %v1435_v31, %v1282_v63  ;;  %v893_v33 = vpop.f32.mrb[33].mxu0 }
 0x2cb   : > { %v931_v34 = vadd.f32 %v1282_v63, %v893_v33  ;;  %v1436_v35 = vpop.f32.mrb[34].mxu0 }
 0x2cc   : > { %954 = vst.msk [vmem:[%s1853_s30 + $0x90] sm:$0xff] %vm935_vm2, %v933_v32  ;;  %v934_v36 = vadd.f32 %v1436_v35, %v1282_v63  ;;  %v896_v37 = vpop.f32.mrb[35].mxu0 }
 0x2cd   : > { %952 = vst.msk [vmem:[%s1853_s30 + $0x80] sm:$0xff] %vm935_vm2, %v931_v34  ;;  %v932_v38 = vadd.f32 %v1282_v63, %v896_v37 }
 0x2ce   : > { %955 = vst.msk [vmem:[%s1853_s30 + $0x98] sm:$0xff] %vm935_vm2, %v934_v36 }
 0x2cf   : > { %953 = vst.msk [vmem:[%s1853_s30 + $0x88] sm:$0xff] %vm935_vm2, %v932_v38 }
 0x2d0   : > { %s2014_s24 = smov (!%p965_p8, %s964_s24), 20 }
 0x2d1   : > { %s1283_s15 = sshll.u32 %s2014_s24, 7 }
 0x2d2   : > { %p1286_p9 = scmp.eq.s32.totalorder %s1283_s15, 0 }
 0x2d3   : > { %1547 = sdivrem.u32 (!%p1286_p9), %s2014_s24, 20 }
 0x2d4   : > { %973 = sbr.rel (%p1286_p9) target bundleno = 783 (0x30f), region = 56 }
 0x2dc   : > { %s1908_s9 = spop.drf %1547 }
 0x2dd   : > { %p1287_p10 = scmp.le.s32.totalorder %s1908_s9, 0 }
 0x2de   : > { %s2007_s27 = smov (!%p1287_p10), %s1902_s14  ;;  %s2008_s12 = smov (!%p1287_p10), %s1853_s30 }
 0x2df   : > { %1205 = sbr.rel (%p1287_p10) target bundleno = 754 (0x2f2), region = 132  ;;  %s1917_s16 = smov (!%p1287_p10), 0  }
 0x2e0   : > { %s1919_s17 = smov (!%p1287_p10), 0  }
 0x2e6 LB: >> { %v1075_v39 = vld [vmem:[%s1613_s12] sm:$0xff]  ;;  %v1077_v40 = vld [vmem:[%s1613_s12 + $0x8] sm:$0xff]  ;;  %v1079_v41 = vld [vmem:[%s1613_s12 + $0x10] sm:$0xff]  ;;  %s1115_s18 = sadd.s32 1, %s1617_s16  ;;  %s1069_s17 = sadd.s32 1, %s1621_s17   ;;  %s1621_s17 = sphi %s1919_s17, %s1069_s17   ;;  %s1617_s16 = sphi %s1917_s16, %s2009_s16   ;;  %s1613_s12 = sphi %s2008_s12, %s1120_s12   ;;  %s1609_s27 = sphi %s2007_s27, %s1121_s27  }
 0x2e7   : >> { %1076 = vst [vmem:[%s1609_s27] sm:$0xff] %v1075_v39  ;;  %1078 = vst [vmem:[%s1609_s27 + $0x8] sm:$0xff] %v1077_v40  ;;  %v1081_v42 = vld [vmem:[%s1613_s12 + $0x18] sm:$0xff]  ;;  %v1083_v43 = vld [vmem:[%s1613_s12 + $0x20] sm:$0xff]  ;;  %p1116_p11 = scmp.ge.s32.totalorder %s1115_s18, %s1908_s9  ;;  %p1068_p12 = scmp.ge.s32.totalorder %s1069_s17, %s1908_s9 }
 0x2e8   : >> { %1080 = vst [vmem:[%s1609_s27 + $0x10] sm:$0xff] %v1079_v41  ;;  %v1085_v44 = vld [vmem:[%s1613_s12 + $0x28] sm:$0xff]  ;;  %1082 = vst [vmem:[%s1609_s27 + $0x18] sm:$0xff] %v1081_v42  ;;  %v1087_v45 = vld [vmem:[%s1613_s12 + $0x30] sm:$0xff] }
 0x2e9   : >> { %1084 = vst [vmem:[%s1609_s27 + $0x20] sm:$0xff] %v1083_v43  ;;  %1086 = vst [vmem:[%s1609_s27 + $0x28] sm:$0xff] %v1085_v44  ;;  %v1089_v47 = vld [vmem:[%s1613_s12 + $0x38] sm:$0xff]  ;;  %v1091_v48 = vld [vmem:[%s1613_s12 + $0x40] sm:$0xff]  ;;  %s2016_s18 = smov (%p1116_p11, %s1115_s18), 0 }
 0x2ea   : >> { %1088 = vst [vmem:[%s1609_s27 + $0x30] sm:$0xff] %v1087_v45  ;;  %1090 = vst [vmem:[%s1609_s27 + $0x38] sm:$0xff] %v1089_v47  ;;  %v1093_v49 = vld [vmem:[%s1613_s12 + $0x48] sm:$0xff]  ;;  %v1095_v50 = vld [vmem:[%s1613_s12 + $0x50] sm:$0xff]  ;;  %s1118_s19 = smul.u32 160, %s2016_s18  ;;  %s2009_s16 = smov %s2016_s18 }
 0x2eb   : >> { %1092 = vst [vmem:[%s1609_s27 + $0x40] sm:$0xff] %v1091_v48  ;;  %v1097_v51 = vld [vmem:[%s1613_s12 + $0x58] sm:$0xff]  ;;  %1094 = vst [vmem:[%s1609_s27 + $0x48] sm:$0xff] %v1093_v49  ;;  %v1099_v52 = vld [vmem:[%s1613_s12 + $0x60] sm:$0xff]  ;;  %1071 = sbr.rel (!%p1068_p12) target bundleno = 742 (0x2e6), region = 138 }
 0x2ec   : >> { %1096 = vst [vmem:[%s1609_s27 + $0x50] sm:$0xff] %v1095_v50  ;;  %1098 = vst [vmem:[%s1609_s27 + $0x58] sm:$0xff] %v1097_v51  ;;  %v1101_v53 = vld [vmem:[%s1613_s12 + $0x68] sm:$0xff]  ;;  %v1103_v54 = vld [vmem:[%s1613_s12 + $0x70] sm:$0xff] }
 0x2ed   : >> { %1100 = vst [vmem:[%s1609_s27 + $0x60] sm:$0xff] %v1099_v52  ;;  %1102 = vst [vmem:[%s1609_s27 + $0x68] sm:$0xff] %v1101_v53  ;;  %v1105_v46 = vld [vmem:[%s1613_s12 + $0x78] sm:$0xff]  ;;  %v1107_v56 = vld [vmem:[%s1613_s12 + $0x80] sm:$0xff] }
 0x2ee   : >> { %1104 = vst [vmem:[%s1609_s27 + $0x70] sm:$0xff] %v1103_v54  ;;  %v1109_v57 = vld [vmem:[%s1613_s12 + $0x88] sm:$0xff]  ;;  %1106 = vst [vmem:[%s1609_s27 + $0x78] sm:$0xff] %v1105_v46  ;;  %v1111_v58 = vld [vmem:[%s1613_s12 + $0x90] sm:$0xff] }
 0x2ef   : >> { %1108 = vst [vmem:[%s1609_s27 + $0x80] sm:$0xff] %v1107_v56  ;;  %1110 = vst [vmem:[%s1609_s27 + $0x88] sm:$0xff] %v1109_v57  ;;  %v1113_v59 = vld [vmem:[%s1613_s12 + $0x98] sm:$0xff]  ;;  %s1120_s12 = scalar_lea.vmem %s1853_s30, %s1118_s19 [#allocation2]  }
 0x2f0   : >> { %1112 = vst [vmem:[%s1609_s27 + $0x90] sm:$0xff] %v1111_v58  ;;  %1114 = vst [vmem:[%s1609_s27 + $0x98] sm:$0xff] %v1113_v59  ;;  %s1121_s27 = scalar_lea.vmem %s1902_s14, %s1118_s19  }
 0x2f2 PF: > { %1549 = sdivrem.u32 %s2014_s24, 20 }
 0x2f3   : > { %s1288_s20 = smul.u32 160, %s1908_s9 }
 0x2f5   : > { %s1126_s21 = scalar_lea.vmem %s1853_s30, %s1288_s20 [#allocation2]   ;;  %s1128_s22 = scalar_lea.vmem %s1902_s14, %s1288_s20  }
 0x2fb   : > { %s1550_s23 = spop.drf %1549 }
 0x2fc   : > { %p1290_p13 = scmp.le.s32.totalorder %s1550_s23, 0 }
 0x2fd   : > { %s1623_s26 = smov (!%p1290_p13), %s1128_s22   ;;  %s1627_s29 = smov (!%p1290_p13), %s1126_s21  }
 0x2fe   : > { %1219 = sbr.rel (%p1290_p13) target bundleno = 783 (0x30f), region = 143  ;;  %s1631_s10 = smov (!%p1290_p13), 0  }
 0x2ff   : > { %s1635_s11 = smov (!%p1290_p13), 0  }
 0x305 LB: >> { %v1138_v60 = vld [vmem:[%s1629_s29] sm:$0xff]  ;;  %s1140_s13 = sadd.s32 1, %s1633_s10  ;;  %s1132_s11 = sadd.s32 1, %s1637_s11   ;;  %s1637_s11 = sphi %s1635_s11, %s1132_s11   ;;  %s1633_s10 = sphi %s1631_s10, %s1632_s10   ;;  %s1629_s29 = sphi %s1627_s29, %s1145_s29   ;;  %s1625_s26 = sphi %s1623_s26, %s1146_s26  }
 0x306   : >> { %1139 = vst [vmem:[%s1625_s26] sm:$0xff] %v1138_v60  ;;  %p1141_p0 = scmp.ge.s32.totalorder %s1140_s13, %s1550_s23  ;;  %p1131_p1 = scmp.ge.s32.totalorder %s1132_s11, %s1550_s23 }
 0x308   : >> { %s2018_s13 = smov (%p1141_p0, %s1140_s13), 0  ;;  %1134 = sbr.rel (!%p1131_p1) target bundleno = 773 (0x305), region = 149 }
 0x309   : >> { %s1291_s30 = sshll.u32 %s2018_s13, 3  ;;  %s1632_s10 = smov %s2018_s13  }
 0x30a   : >> { %s1145_s29 = scalar_lea.vmem %s1126_s21, %s1291_s30 [#allocation2]   ;;  %s1146_s26 = scalar_lea.vmem %s1128_s22, %s1291_s30  }
 0x30f PF: > { %p14_p2 = scmp.ge.s32.totalorder %s1694_s28, 4   ;;  %s2010_s24 = smov %s1601_s25 }
 0x310   : > { %s2011_s25 = smov %s1702_s8  ;;  %s2012_s26 = smov %s1694_s28 }
 0x311   :  { %16 = sbr.rel (!%p14_p2) target bundleno = 2 (0x2), region = 160 }

</bundles_post_ra>
